<compile_context>
chip_gen: v7x
topology: tpu7x:2x2x1
jax: 0.10.0
libtpu: 0.0.40
codegen_flags: <defaults>
</compile_context>

<pallas_src>
import functools

import jax
import jax.numpy as jnp
from jax.experimental import pallas as pl
from jax.experimental.pallas import tpu as pltpu


def _round_up(x, m):
    return ((x + m - 1) // m) * m


def _block_diag(blocks):
    """Stack 2-D blocks into a block-diagonal matrix."""
    r, c = blocks[0].shape
    s = len(blocks)
    out = jnp.zeros((s * r, s * c), dtype=blocks[0].dtype)
    for i, blk in enumerate(blocks):
        out = out.at[i * r:(i + 1) * r, i * c:(i + 1) * c].set(blk)
    return out


# ----------------------------------------------------------------------------
# Pallas kernel: one grid step = one lane-dense batch tile through
# (fused preprocessing) + (packed block-diagonal MLP).
#
#   x_ref     (F, TB)   raw transposed inputs, batch on lanes   [streamed]
#   gf_ref    (SD, F)   row -> feature gather matrix            [resident]
#   cls_ref   (SD, 1)   one-hot class value per packed row      [resident]
#   isnum_ref (SD, 1)   1.0 where row is a numeric copy         [resident]
#   iscat_ref (SD, 1)   1.0 where row is a one-hot indicator    [resident]
#   rest      W0t,b0t,...,WLt,bLt (block-diag^T weights, resident), o_ref
#   o_ref     (S, TB)   subnet outputs, batch on lanes
# ----------------------------------------------------------------------------
def _fused_interactionnet_kernel(x_ref, gf_ref, cls_ref, isnum_ref, iscat_ref,
                                 *rest, n_hidden_layers):
    o_ref = rest[-1]
    params = rest[:-1]  # interleaved (W_blockdiag^T, b_packed^T) pairs

    x = x_ref[...]                                                     # (F, TB)
    # Fused preprocessing: row r either copies feature feat[r] (numeric),
    # emits the indicator (x[feat[r]] == cls[r]) (categorical one-hot), or
    # stays 0 (padding row). All static-shape VPU work hidden under the DMA.
    xf = jnp.dot(gf_ref[...], x, preferred_element_type=jnp.float32)   # (SD, TB)
    one_hot = (xf == cls_ref[...]).astype(jnp.float32)
    xs = isnum_ref[...] * xf + iscat_ref[...] * one_hot                # packed X^T

    for layer in range(n_hidden_layers):
        w = params[2 * layer][...]
        b = params[2 * layer + 1][...]
        xs = jnp.maximum(
            jnp.dot(w, xs, preferred_element_type=jnp.float32) + b, 0.0)  # ReLU
    w = params[-2][...]
    b = params[-1][...]
    o_ref[...] = jnp.dot(w, xs, preferred_element_type=jnp.float32) + b   # (S, TB)


def interactionnet_forward_fused(inputs, gf, cls_vals, is_num, is_cat,
                                 weights_t, biases_t, *, block_batch=1024):
    """inputs: [B, F] raw features. Returns [B, S] (same as torch forward)."""
    batch, n_feat = inputs.shape
    sd, f = gf.shape
    assert n_feat == f, "gather matrix width must match input feature count"
    n_layers = len(weights_t)
    s_out = weights_t[-1].shape[0]              # == n_interactions

    # Lane-dense batch tile (multiple of 128), sized against a VMEM budget.
    max_width = max(int(w.shape[0]) for w in weights_t)
    bytes_per_col = 4 * (f + s_out + sd + 2 * max_width)
    vmem_budget = 8 << 20
    tb_cap = max(128, (vmem_budget // (2 * bytes_per_col)) // 128 * 128)
    tb = min(_round_up(block_batch, 128), tb_cap, _round_up(batch, 128))
    b_pad = _round_up(batch, tb)

    # Batch rides the lane axis: transpose the tiny raw slab [B,F] -> [F,B]
    # and pad only it (never the packed S*D representation).
    x_t = jnp.transpose(inputs.astype(jnp.float32))
    if b_pad != batch:
        x_t = jnp.pad(x_t, ((0, 0), (0, b_pad - batch)))

    in_specs = [pl.BlockSpec((f, tb), lambda i: (0, i))]
    operands = [x_t]
    for c in (gf, cls_vals, is_num, is_cat):
        in_specs.append(pl.BlockSpec(tuple(c.shape), lambda i: (0, 0)))
        operands.append(c)
    for w, b in zip(weights_t, biases_t):
        # Constant block index -> fetched once, stays resident in VMEM.
        in_specs.append(pl.BlockSpec(tuple(w.shape), lambda i: (0, 0)))
        in_specs.append(pl.BlockSpec(tuple(b.shape), lambda i: (0, 0)))
        operands.append(w)
        operands.append(b)

    param_bytes = 4 * sum(int(a.size) for a in operands[1:])
    stream_bytes = 4 * tb * (f + s_out)
    act_bytes = 4 * tb * (sd + max_width)
    vmem_need = 2 * stream_bytes + 2 * param_bytes + 2 * act_bytes
    vmem_limit = int(min(64 << 20, max(16 << 20, 2 * vmem_need)))

    flops = 2 * b_pad * (int(gf.size) + sum(int(w.size) for w in weights_t))
    bytes_accessed = 4 * (int(x_t.size) + b_pad * s_out) + param_bytes

    out_t = pl.pallas_call(
        functools.partial(_fused_interactionnet_kernel,
                          n_hidden_layers=n_layers - 1),
        out_shape=jax.ShapeDtypeStruct((s_out, b_pad), jnp.float32),
        grid_spec=pl.GridSpec(
            grid=(b_pad // tb,),
            in_specs=in_specs,
            out_specs=pl.BlockSpec((s_out, tb), lambda i: (0, i)),
        ),
        compiler_params=pltpu.CompilerParams(
            dimension_semantics=("parallel",),
            vmem_limit_bytes=vmem_limit),
        cost_estimate=pl.CostEstimate(
            flops=flops, transcendentals=0, bytes_accessed=bytes_accessed),
    )(*operands)

    return jnp.transpose(out_t[:, :batch])     # [B, S]


# ----------------------------------------------------------------------------
# pyInteractionNet in JAX (parameter init + reference path are glue;
# preprocessing + the MLP stack run inside the kernel)
# ----------------------------------------------------------------------------
class PyInteractionNetJAX:
    def __init__(self, interaction_list, nfeature_index_list, cfeature_index_list,
                 num_classes_list, subnet_arch, key):
        self.interaction_list = interaction_list
        self.n_interactions = len(interaction_list)
        self.nfeature_index_list = nfeature_index_list
        self.cfeature_index_list = cfeature_index_list
        self.num_classes_list = num_classes_list
        self.subnet_arch = subnet_arch

        self.n_inputs1 = []
        self.n_inputs2 = []
        for (a, b) in interaction_list:
            self.n_inputs1.append(
                num_classes_list[cfeature_index_list.index(a)]
                if a in cfeature_index_list else 1)
            self.n_inputs2.append(
                num_classes_list[cfeature_index_list.index(b)]
                if b in cfeature_index_list else 1)
        self.max_n_inputs = max(self.n_inputs1[i] + self.n_inputs2[i]
                                for i in range(self.n_interactions))
        self.n_features = max(list(nfeature_index_list)
                              + list(cfeature_index_list)) + 1

        # ---- TensorLayer parameters: orthogonal weights per subnet, zero biases.
        dims = [self.max_n_inputs] + list(subnet_arch) + [1]
        self.weights = []   # stacked [S, d_in, d_out]   (reference path)
        self.biases = []    # stacked [S, 1, d_out]      (reference path)
        for li in range(len(dims) - 1):
            d_in, d_out = dims[li], dims[li + 1]
            ws = []
            for _s in range(self.n_interactions):
                key, sub = jax.random.split(key)
                m = jax.random.normal(sub, (max(d_in, d_out), min(d_in, d_out)),
                                      dtype=jnp.float32)
                q, r = jnp.linalg.qr(m)
                d = jnp.sign(jnp.diagonal(r))
                d = jnp.where(d == 0, 1.0, d)          # avoid degenerate zero sign
                q = q * d
                w = q if d_in >= d_out else q.T
                ws.append(w.reshape(d_in, d_out))
            self.weights.append(jnp.stack(ws, axis=0))
            self.biases.append(jnp.zeros((self.n_interactions, 1, d_out),
                                         dtype=jnp.float32))

        # ---- Packed, TRANSPOSED block-diagonal parameters for the kernel.
        # W_l^T packed: [S*d_out, S*d_in]; b_l^T packed: [S*d_out, 1].
        self.packed_weights_t = []
        self.packed_biases_t = []
        for w, b in zip(self.weights, self.biases):
            self.packed_weights_t.append(
                _block_diag([w[s].T for s in range(self.n_interactions)]))
            self.packed_biases_t.append(b.reshape(-1, 1))

        # ---- Constants describing the fused preprocessing (packed-row plan).
        rows_feat, rows_cls, rows_isnum, rows_iscat = [], [], [], []
        for i, (a, b) in enumerate(interaction_list):
            for idx, n_in in ((a, self.n_inputs1[i]), (b, self.n_inputs2[i])):
                if idx in cfeature_index_list:
                    for k in range(n_in):
                        rows_feat.append(idx)
                        rows_cls.append(float(k))
                        rows_isnum.append(0.0)
                        rows_iscat.append(1.0)
                else:
                    rows_feat.append(idx)
                    rows_cls.append(-1.0)
                    rows_isnum.append(1.0)
                    rows_iscat.append(0.0)
            pad = self.max_n_inputs - (self.n_inputs1[i] + self.n_inputs2[i])
            for _ in range(pad):
                rows_feat.append(-1)
                rows_cls.append(-1.0)
                rows_isnum.append(0.0)
                rows_iscat.append(0.0)
        sd = self.n_interactions * self.max_n_inputs
        assert len(rows_feat) == sd
        gf = jnp.zeros((sd, self.n_features), dtype=jnp.float32)
        for r, fidx in enumerate(rows_feat):
            if fidx >= 0:
                gf = gf.at[r, fidx].set(1.0)
        self.gather_mat = gf                                       # [SD, F]
        self.cls_vals = jnp.asarray(rows_cls, jnp.float32).reshape(sd, 1)
        self.is_num = jnp.asarray(rows_isnum, jnp.float32).reshape(sd, 1)
        self.is_cat = jnp.asarray(rows_iscat, jnp.float32).reshape(sd, 1)

    # Reference-path preprocessing (mirrors the torch module).
    def preprocessing(self, inputs):
        blocks = []
        for i, (idx1, idx2) in enumerate(self.interaction_list):
            parts = []
            if idx1 in self.cfeature_index_list:
                parts.append(jax.nn.one_hot(inputs[:, idx1].astype(jnp.int32),
                                            self.n_inputs1[i], dtype=jnp.float32))
            else:
                parts.append(inputs[:, idx1:idx1 + 1])
            if idx2 in self.cfeature_index_list:
                parts.append(jax.nn.one_hot(inputs[:, idx2].astype(jnp.int32),
                                            self.n_inputs2[i], dtype=jnp.float32))
            else:
                parts.append(inputs[:, idx2:idx2 + 1])
            pad = self.max_n_inputs - (self.n_inputs1[i] + self.n_inputs2[i])
            if pad > 0:
                parts.append(jnp.zeros((inputs.shape[0], pad), dtype=jnp.float32))
            blocks.append(jnp.concatenate(parts, axis=1))
        return jnp.concatenate(blocks, axis=1)  # [B, S*max_n_inputs]

    def forward(self, inputs, *, block_batch=1024):
        gf = self.gather_mat
        if inputs.shape[1] > gf.shape[1]:
            gf = jnp.pad(gf, ((0, 0), (0, inputs.shape[1] - gf.shape[1])))
        assert inputs.shape[1] == gf.shape[1]
        return interactionnet_forward_fused(
            inputs, gf, self.cls_vals, self.is_num, self.is_cat,
            self.packed_weights_t, self.packed_biases_t,
            block_batch=block_batch)

    # Pure-JAX reference replicating torch TensorLayer.forward (per-subnet matmuls).
    def forward_reference(self, inputs):
        pre = self.preprocessing(inputs)
        xs = jnp.transpose(
            pre.reshape(-1, self.n_interactions, self.max_n_inputs), (1, 0, 2))
        for li in range(len(self.subnet_arch)):
            xs = jax.nn.relu(jnp.matmul(xs, self.weights[li]) + self.biases[li])
        out = jnp.matmul(xs, self.weights[-1]) + self.biases[-1]
        return jnp.transpose(out, (1, 0, 2))[:, :, 0]


if __name__ == "__main__":
    key = jax.random.PRNGKey(0)

    # Small deterministic config:
    #   4 features: cols 0,1 numeric; cols 2,3 categorical (3 and 4 classes)
    interaction_list = [(0, 1), (0, 2), (2, 3)]
    nfeature_index_list = [0, 1]
    cfeature_index_list = [2, 3]
    num_classes_list = [3, 4]
    subnet_arch = [16, 8]          # two hidden layers, ReLU activation

    key, k_model, k_num, k_c1, k_c2 = jax.random.split(key, 5)
    model = PyInteractionNetJAX(interaction_list, nfeature_index_list,
                                cfeature_index_list, num_classes_list,
                                subnet_arch, k_model)

    # --- test 1: tiny batch (single tile, padded lanes) ---
    batch = 8
    numeric = jax.random.normal(k_num, (batch, 2), dtype=jnp.float32)
    cat1 = jax.random.randint(k_c1, (batch, 1), 0, 3).astype(jnp.float32)
    cat2 = jax.random.randint(k_c2, (batch, 1), 0, 4).astype(jnp.float32)
    inputs = jnp.concatenate([numeric, cat1, cat2], axis=1)  # [batch, 4]

    out = model.forward(inputs)
    jax.block_until_ready(out)
    ref = model.forward_reference(inputs)
    assert out.shape == (batch, len(interaction_list))
    assert jnp.allclose(out, ref, atol=1e-5, rtol=1e-5), \
        "Pallas kernel mismatch (small batch)"

    # --- test 2: larger batch with remainder -> exercises batch tiling ---
    key, k_num2, k_c12, k_c22 = jax.random.split(key, 4)
    batch2 = 300
    numeric2 = jax.random.normal(k_num2, (batch2, 2), dtype=jnp.float32)
    cat12 = jax.random.randint(k_c12, (batch2, 1), 0, 3).astype(jnp.float32)
    cat22 = jax.random.randint(k_c22, (batch2, 1), 0, 4).astype(jnp.float32)
    inputs2 = jnp.concatenate([numeric2, cat12, cat22], axis=1)

    out2 = model.forward(inputs2, block_batch=128)   # 3 grid steps, tail pad on lanes
    jax.block_until_ready(out2)
    ref2 = model.forward_reference(inputs2)
    assert out2.shape == (batch2, len(interaction_list))
    assert jnp.allclose(out2, ref2, atol=1e-5, rtol=1e-5), \
        "Pallas kernel mismatch (tiled batch)"

    print("KERNEL_OK")
</pallas_src>

<mosaic_0001>
module attributes {stable_mosaic.version = 11 : i64} {
  func.func @_fused_interactionnet_kernel(%arg0: i32, %arg1: memref<4x128xf32, #tpu.memory_space<vmem>>, %arg2: memref<21x4xf32, #tpu.memory_space<vmem>>, %arg3: memref<21x1xf32, #tpu.memory_space<vmem>>, %arg4: memref<21x1xf32, #tpu.memory_space<vmem>>, %arg5: memref<21x1xf32, #tpu.memory_space<vmem>>, %arg6: memref<48x21xf32, #tpu.memory_space<vmem>>, %arg7: memref<48x1xf32, #tpu.memory_space<vmem>>, %arg8: memref<24x48xf32, #tpu.memory_space<vmem>>, %arg9: memref<24x1xf32, #tpu.memory_space<vmem>>, %arg10: memref<3x24xf32, #tpu.memory_space<vmem>>, %arg11: memref<3x1xf32, #tpu.memory_space<vmem>>, %arg12: memref<3x128xf32, #tpu.memory_space<vmem>>) attributes {dimension_semantics = [#tpu.dimension_semantics<parallel>], iteration_bounds = array<i64: 1>, scalar_prefetch = 0 : i64, scratch_operands = 0 : i64, tpu.core_type = #tpu.core_type<tc>, window_params = [{transform_indices = @transform_0, window_bounds = array<i64: 4, 128>}, {pipeline_mode = #tpu.pipeline_mode<synchronous>, transform_indices = @transform_1, window_bounds = array<i64: 21, 4>}, {pipeline_mode = #tpu.pipeline_mode<synchronous>, transform_indices = @transform_2, window_bounds = array<i64: 21, 1>}, {pipeline_mode = #tpu.pipeline_mode<synchronous>, transform_indices = @transform_3, window_bounds = array<i64: 21, 1>}, {pipeline_mode = #tpu.pipeline_mode<synchronous>, transform_indices = @transform_4, window_bounds = array<i64: 21, 1>}, {pipeline_mode = #tpu.pipeline_mode<synchronous>, transform_indices = @transform_5, window_bounds = array<i64: 48, 21>}, {pipeline_mode = #tpu.pipeline_mode<synchronous>, transform_indices = @transform_6, window_bounds = array<i64: 48, 1>}, {pipeline_mode = #tpu.pipeline_mode<synchronous>, transform_indices = @transform_7, window_bounds = array<i64: 24, 48>}, {pipeline_mode = #tpu.pipeline_mode<synchronous>, transform_indices = @transform_8, window_bounds = array<i64: 24, 1>}, {pipeline_mode = #tpu.pipeline_mode<synchronous>, transform_indices = @transform_9, window_bounds = array<i64: 3, 24>}, {pipeline_mode = #tpu.pipeline_mode<synchronous>, transform_indices = @transform_10, window_bounds = array<i64: 3, 1>}, {transform_indices = @transform_11, window_bounds = array<i64: 3, 128>}]} {
    %c0 = arith.constant 0 : index
    %c0_0 = arith.constant 0 : index
    %0 = vector.load %arg1[%c0, %c0_0] : memref<4x128xf32, #tpu.memory_space<vmem>>, vector<4x128xf32>
    %c0_1 = arith.constant 0 : index
    %c0_2 = arith.constant 0 : index
    %1 = vector.load %arg2[%c0_1, %c0_2] : memref<21x4xf32, #tpu.memory_space<vmem>>, vector<21x4xf32>
    %cst = arith.constant dense<0.000000e+00> : vector<21x128xf32>
    %2 = tpu.matmul %1, %0, %cst {dimension_numbers = #tpu.dot_dimension_numbers<[1], [0], [0], [1], [0, 0, 1, 1], [], []>} : vector<21x4xf32>, vector<4x128xf32>, vector<21x128xf32> -> vector<21x128xf32>
    %c0_3 = arith.constant 0 : index
    %c0_4 = arith.constant 0 : index
    %3 = vector.load %arg3[%c0_3, %c0_4] : memref<21x1xf32, #tpu.memory_space<vmem>>, vector<21x1xf32>
    %4 = vector.broadcast %3 : vector<21x1xf32> to vector<21x128xf32>
    %5 = arith.cmpf oeq, %2, %4 : vector<21x128xf32>
    %6 = arith.extui %5 : vector<21x128xi1> to vector<21x128xi32>
    %7 = arith.sitofp %6 : vector<21x128xi32> to vector<21x128xf32>
    %c0_5 = arith.constant 0 : index
    %c0_6 = arith.constant 0 : index
    %8 = vector.load %arg4[%c0_5, %c0_6] : memref<21x1xf32, #tpu.memory_space<vmem>>, vector<21x1xf32>
    %9 = vector.broadcast %8 : vector<21x1xf32> to vector<21x128xf32>
    %10 = arith.mulf %9, %2 : vector<21x128xf32>
    %c0_7 = arith.constant 0 : index
    %c0_8 = arith.constant 0 : index
    %11 = vector.load %arg5[%c0_7, %c0_8] : memref<21x1xf32, #tpu.memory_space<vmem>>, vector<21x1xf32>
    %12 = vector.broadcast %11 : vector<21x1xf32> to vector<21x128xf32>
    %13 = arith.mulf %12, %7 : vector<21x128xf32>
    %14 = arith.addf %10, %13 : vector<21x128xf32>
    %c0_9 = arith.constant 0 : index
    %c0_10 = arith.constant 0 : index
    %15 = vector.load %arg6[%c0_9, %c0_10] : memref<48x21xf32, #tpu.memory_space<vmem>>, vector<48x21xf32>
    %c0_11 = arith.constant 0 : index
    %c0_12 = arith.constant 0 : index
    %16 = vector.load %arg7[%c0_11, %c0_12] : memref<48x1xf32, #tpu.memory_space<vmem>>, vector<48x1xf32>
    %cst_13 = arith.constant dense<0.000000e+00> : vector<48x128xf32>
    %17 = tpu.matmul %15, %14, %cst_13 {dimension_numbers = #tpu.dot_dimension_numbers<[1], [0], [0], [1], [0, 0, 1, 1], [], []>} : vector<48x21xf32>, vector<21x128xf32>, vector<48x128xf32> -> vector<48x128xf32>
    %18 = vector.broadcast %16 : vector<48x1xf32> to vector<48x128xf32>
    %19 = arith.addf %17, %18 : vector<48x128xf32>
    %cst_14 = arith.constant 0.000000e+00 : f32
    %20 = vector.broadcast %cst_14 : f32 to vector<48x128xf32>
    %21 = arith.maximumf %19, %20 : vector<48x128xf32>
    %c0_15 = arith.constant 0 : index
    %c0_16 = arith.constant 0 : index
    %22 = vector.load %arg8[%c0_15, %c0_16] : memref<24x48xf32, #tpu.memory_space<vmem>>, vector<24x48xf32>
    %c0_17 = arith.constant 0 : index
    %c0_18 = arith.constant 0 : index
    %23 = vector.load %arg9[%c0_17, %c0_18] : memref<24x1xf32, #tpu.memory_space<vmem>>, vector<24x1xf32>
    %cst_19 = arith.constant dense<0.000000e+00> : vector<24x128xf32>
    %24 = tpu.matmul %22, %21, %cst_19 {dimension_numbers = #tpu.dot_dimension_numbers<[1], [0], [0], [1], [0, 0, 1, 1], [], []>} : vector<24x48xf32>, vector<48x128xf32>, vector<24x128xf32> -> vector<24x128xf32>
    %25 = vector.broadcast %23 : vector<24x1xf32> to vector<24x128xf32>
    %26 = arith.addf %24, %25 : vector<24x128xf32>
    %cst_20 = arith.constant 0.000000e+00 : f32
    %27 = vector.broadcast %cst_20 : f32 to vector<24x128xf32>
    %28 = arith.maximumf %26, %27 : vector<24x128xf32>
    %c0_21 = arith.constant 0 : index
    %c0_22 = arith.constant 0 : index
    %29 = vector.load %arg10[%c0_21, %c0_22] : memref<3x24xf32, #tpu.memory_space<vmem>>, vector<3x24xf32>
    %c0_23 = arith.constant 0 : index
    %c0_24 = arith.constant 0 : index
    %30 = vector.load %arg11[%c0_23, %c0_24] : memref<3x1xf32, #tpu.memory_space<vmem>>, vector<3x1xf32>
    %cst_25 = arith.constant dense<0.000000e+00> : vector<3x128xf32>
    %31 = tpu.matmul %29, %28, %cst_25 {dimension_numbers = #tpu.dot_dimension_numbers<[1], [0], [0], [1], [0, 0, 1, 1], [], []>} : vector<3x24xf32>, vector<24x128xf32>, vector<3x128xf32> -> vector<3x128xf32>
    %32 = vector.broadcast %30 : vector<3x1xf32> to vector<3x128xf32>
    %33 = arith.addf %31, %32 : vector<3x128xf32>
    %c0_26 = arith.constant 0 : index
    %c0_27 = arith.constant 0 : index
    %34 = vector.load %arg12[%c0_26, %c0_27] : memref<3x128xf32, #tpu.memory_space<vmem>>, vector<3x128xf32>
    tpu.vector_store %arg12[%c0_26, %c0_27], %33 {strides = array<i32>} : memref<3x128xf32, #tpu.memory_space<vmem>>, vector<3x128xf32>,
    return
  }
  func.func @transform_0(%arg0: i32) -> (i32, i32) {
    %c0_i32 = arith.constant 0 : i32
    %c0_i32_0 = arith.constant 0 : i32
    return %c0_i32, %arg0 : i32, i32
  }
  func.func @transform_1(%arg0: i32) -> (i32, i32) {
    %c0_i32 = arith.constant 0 : i32
    %c0_i32_0 = arith.constant 0 : i32
    %c0_i32_1 = arith.constant 0 : i32
    return %c0_i32, %c0_i32_0 : i32, i32
  }
  func.func @transform_2(%arg0: i32) -> (i32, i32) {
    %c0_i32 = arith.constant 0 : i32
    %c0_i32_0 = arith.constant 0 : i32
    %c0_i32_1 = arith.constant 0 : i32
    return %c0_i32, %c0_i32_0 : i32, i32
  }
  func.func @transform_3(%arg0: i32) -> (i32, i32) {
    %c0_i32 = arith.constant 0 : i32
    %c0_i32_0 = arith.constant 0 : i32
    %c0_i32_1 = arith.constant 0 : i32
    return %c0_i32, %c0_i32_0 : i32, i32
  }
  func.func @transform_4(%arg0: i32) -> (i32, i32) {
    %c0_i32 = arith.constant 0 : i32
    %c0_i32_0 = arith.constant 0 : i32
    %c0_i32_1 = arith.constant 0 : i32
    return %c0_i32, %c0_i32_0 : i32, i32
  }
  func.func @transform_5(%arg0: i32) -> (i32, i32) {
    %c0_i32 = arith.constant 0 : i32
    %c0_i32_0 = arith.constant 0 : i32
    %c0_i32_1 = arith.constant 0 : i32
    return %c0_i32, %c0_i32_0 : i32, i32
  }
  func.func @transform_6(%arg0: i32) -> (i32, i32) {
    %c0_i32 = arith.constant 0 : i32
    %c0_i32_0 = arith.constant 0 : i32
    %c0_i32_1 = arith.constant 0 : i32
    return %c0_i32, %c0_i32_0 : i32, i32
  }
  func.func @transform_7(%arg0: i32) -> (i32, i32) {
    %c0_i32 = arith.constant 0 : i32
    %c0_i32_0 = arith.constant 0 : i32
    %c0_i32_1 = arith.constant 0 : i32
    return %c0_i32, %c0_i32_0 : i32, i32
  }
  func.func @transform_8(%arg0: i32) -> (i32, i32) {
    %c0_i32 = arith.constant 0 : i32
    %c0_i32_0 = arith.constant 0 : i32
    %c0_i32_1 = arith.constant 0 : i32
    return %c0_i32, %c0_i32_0 : i32, i32
  }
  func.func @transform_9(%arg0: i32) -> (i32, i32) {
    %c0_i32 = arith.constant 0 : i32
    %c0_i32_0 = arith.constant 0 : i32
    %c0_i32_1 = arith.constant 0 : i32
    return %c0_i32, %c0_i32_0 : i32, i32
  }
  func.func @transform_10(%arg0: i32) -> (i32, i32) {
    %c0_i32 = arith.constant 0 : i32
    %c0_i32_0 = arith.constant 0 : i32
    %c0_i32_1 = arith.constant 0 : i32
    return %c0_i32, %c0_i32_0 : i32, i32
  }
  func.func @transform_11(%arg0: i32) -> (i32, i32) {
    %c0_i32 = arith.constant 0 : i32
    %c0_i32_0 = arith.constant 0 : i32
    return %c0_i32, %arg0 : i32, i32
  }
}

</mosaic_0001>

<bundles_post_ra>
// kernel: tpu_custom_call.1
= control target key start
LH: loop header
LB: loop body
LE: loop exit
PB: predicated region body
PF: predicated region fallthrough
CT: control target
= control target key end

     0   :  { %vm53_vm0 = vcmask 1043456   ;;  %v732_v2 = vmov 0.0   ;;  %vm733_vm1 = vmmov 0   ;;  %vm43_vm2 = vcmask 31744   ;;  %s936_s0 = inlined_call_operand.vmem [shape: f32[4,128], index: 0, kind: input, shape index: {}]   ;;  %s937_s1 = inlined_call_operand.vmem [shape: f32[21,4], index: 1, kind: input, shape index: {}]   ;;  %s938_s2 = inlined_call_operand.vmem [shape: f32[21,1], index: 2, kind: input, shape index: {}]   ;;  %s939_s3 = inlined_call_operand.vmem [shape: f32[21,1], index: 3, kind: input, shape index: {}]   ;;  %s940_s4 = inlined_call_operand.vmem [shape: f32[21,1], index: 4, kind: input, shape index: {}]   ;;  %s941_s5 = inlined_call_operand.vmem [shape: f32[48,21], index: 5, kind: input, shape index: {}]   ;;  %s942_s6 = inlined_call_operand.vmem [shape: f32[48,1], index: 6, kind: input, shape index: {}]   ;;  %s943_s7 = inlined_call_operand.vmem [shape: f32[24,48], index: 7, kind: input, shape index: {}]   ;;  %s944_s8 = inlined_call_operand.vmem [shape: f32[24,1], index: 8, kind: input, shape index: {}]   ;;  %s945_s9 = inlined_call_operand.vmem [shape: f32[3,24], index: 9, kind: input, shape index: {}]   ;;  %s946_s10 = inlined_call_operand.vmem [shape: f32[3,1], index: 10, kind: input, shape index: {}]   ;;  %s947_s11 = inlined_call_operand.hbm [shape: f32[3,128], index: 11, kind: output, shape index: {}]  }
   0x1   :  { %v39_v0 = vld [vmem:[%s936_s0] sm:$0xf]  ;;  %629 = vmatprep.subr.mxu0 %v732_v2  ;;  %631 = vmatprep.mubr.msk.f32.mxu0 %vm733_vm1, %v732_v2  ;;  %v734_v4 = vmov 0   ;;  %v41_v6 = vld [vmem:[%s937_s1 + $0x8] sm:$0xff]  ;;  %v42_v9 = vld [vmem:[%s937_s1 + $0x10] sm:$0x1f] }
   0x2   :  { %v40_v1 = vld [vmem:[%s937_s1] sm:$0xff]  ;;  %630 = vmatpush3.msk.msra.mxu0 %vm53_vm0, %v39_v0  ;;  %706 = vset.pattern.permute.xlu0 %v734_v4  ;;  %v138_v7 = vld [vmem:[%s938_s2 + $0x8] sm:$0xff] }
   0x3   :  { %v137_v3 = vld [vmem:[%s938_s2] sm:$0xff]  ;;  %632 = vmatmul.mubr.msk.f32.vlgmr.msra.gmra.mrb[0].mxu0 %vm43_vm2, %v40_v1  ;;  %707 = vset.pattern.permute.xlu1 %v734_v4  ;;  %v165_v8 = vld [vmem:[%s939_s3 + $0x8] sm:$0xff] }
   0x4   :  { %v164_v5 = vld [vmem:[%s939_s3] sm:$0xff]  ;;  %142 = vperm.xlu0 %706, %v137_v3   ;;  %634 = vmatprep.mubr.msk.f32.mxu0 %vm733_vm1, %v732_v2 }
   0x5   :  { %169 = vperm.xlu1 %707, %v164_v5   ;;  %v185_v10 = vld [vmem:[%s940_s4] sm:$0xff] }
   0x7   :  { %635 = vmatmul.mubr.msk.f32.gmra.mrb[2].mxu0 %vm43_vm2, %v41_v6 }
   0x8   :  { %147 = vperm.xlu0 %706, %v138_v7   ;;  %637 = vmatprep.mubr.msk.f32.mxu0 %vm733_vm1, %v732_v2 }
   0x9   :  { %16 = vsyncpa [#allocation3], 0  ;;  %174 = vperm.xlu1 %707, %v165_v8   ;;  %v186_v11 = vld [vmem:[%s940_s4 + $0x8] sm:$0xff]  ;;  %v139_v12 = vld [vmem:[%s938_s2 + $0x10] sm:$0x1f]  ;;  %vm251_vm3 = vcmask 171008  }
   0xa   :  { %v166_v13 = vld [vmem:[%s939_s3 + $0x10] sm:$0x1f]  ;;  %v215_v15 = vld [vmem:[%s942_s6] sm:$0xff]  ;;  %v216_v16 = vld [vmem:[%s942_s6 + $0x8] sm:$0xff]  ;;  %vm270_vm7 = vcmask 1044480   ;;  %v735_v59 = vmov 0.0|0.0  }
   0xb   :  { %638 = vmatmul.mubr.msk.f32.gmra.mrb[4].mxu0 %vm43_vm2, %v42_v9  ;;  %v187_v14 = vld [vmem:[%s940_s4 + $0x10] sm:$0x1f]  ;;  %v218_v18 = vld [vmem:[%s942_s6 + $0x18] sm:$0xff]  ;;  %v219_v19 = vld [vmem:[%s942_s6 + $0x20] sm:$0xff]  ;;  %689 = vmatprep.subr.bf16.mxu0 %v735_v59  ;;  %vm396_vm8 = vcmask 392192   ;;  %vm496_vm9 = vcmask 195584  }
   0xc   :  { %190 = vperm.xlu0 %706, %v185_v10   ;;  %667 = vmatprep.mubr.msk.f32.mxu0 %vm733_vm1, %v732_v2  ;;  %v217_v17 = vld [vmem:[%s942_s6 + $0x10] sm:$0xff]  ;;  %v220_v20 = vld [vmem:[%s942_s6 + $0x28] sm:$0xff]  ;;  %v378_v21 = vld [vmem:[%s944_s8] sm:$0xff]  ;;  %s736_s29 = smov [#allocation2]  }
   0xd   :  { %195 = vperm.xlu1 %707, %v186_v11   ;;  %v379_v22 = vld [vmem:[%s944_s8 + $0x8] sm:$0xff]  ;;  %v380_v23 = vld [vmem:[%s944_s8 + $0x10] sm:$0xff]  ;;  %v490_v24 = vld [vmem:[%s946_s10] sm:$0x7]  ;;  %s577_s30 = sshll.u32 %s736_s29, 4  ;;  %s578_s30 = int_to_ptr.vmem [resolvable:$true] %s577_s30 }
   0xe   :  { %v209_v25 = vld [vmem:[%s941_s5] sm:$0xff]  ;;  %v210_v54 = vld [vmem:[%s941_s5 + $0x8] sm:$0xff]  ;;  %v211_v55 = vld [vmem:[%s941_s5 + $0x10] sm:$0xff]  ;;  %s708_s12 = scalar_lea.vmem %s578_s30, 64  ;;  %p713_p1 = scmp.lt.s32.totalorder %s578_s30, %s578_s30 }
   0xf   :  { %646 = vmatprep.mubr.msk.f32.mxu1 %vm251_vm3, %v209_v25  ;;  %v212_v56 = vld [vmem:[%s941_s5 + $0x18] sm:$0xff]  ;;  %v213_v57 = vld [vmem:[%s941_s5 + $0x20] sm:$0xff]  ;;  %v214_v58 = vld [vmem:[%s941_s5 + $0x28] sm:$0xff]  ;;  %p709_p0 = scmp.ne.s32.totalorder %s578_s30, %s708_s12  ;;  %p714_p2 = scmp.lt.s32.totalorder %s708_s12, %s708_s12 }
  0x10   :  { %152 = vperm.xlu0 %706, %v139_v12   ;;  %v376_v25 = vld [vmem:[%s943_s7 + $0x8] sm:$0xff] }
  0x11   :  { %179 = vperm.xlu1 %707, %v166_v13   ;;  %p715_p3 = por %p714_p2, %p713_p1 }
  0x13   :  { %p716_p4 = pnand %p715_p3, %p709_p0 }
  0x14   :  { %200 = vperm.xlu0 %706, %v187_v14  }
  0x15   :  { %223 = vperm.xlu1 %707, %v215_v15  }
  0x18   :  { %228 = vperm.xlu0 %706, %v216_v16  }
  0x19   :  { %233 = vperm.xlu1 %707, %v217_v17  }
  0x1c   :  { %238 = vperm.xlu0 %706, %v218_v18  }
  0x1d   :  { %243 = vperm.xlu1 %707, %v219_v19  }
  0x20   :  { %248 = vperm.xlu0 %706, %v220_v20  }
  0x21   :  { %383 = vperm.xlu1 %707, %v378_v21  }
  0x24   :  { %388 = vperm.xlu0 %706, %v379_v22  }
  0x25   :  { %393 = vperm.xlu1 %707, %v380_v23  }
  0x28   :  { %493 = vperm.xlu0 %706, %v490_v24   ;;  %v375_v24 = vld [vmem:[%s943_s7] sm:$0xff] }
  0x83   :  { %v143_v26 = vpop.permute.xlu0 %142 }
  0x84   :  { %v170_v27 = vpop.permute.xlu1 %169 }
  0x87   :  { %v148_v28 = vpop.permute.xlu0 %147 }
  0x88   :  { %v175_v29 = vpop.permute.xlu1 %174 }
  0x8b   :  { %v191_v30 = vpop.permute.xlu0 %190 }
  0x8c   :  { %v196_v34 = vpop.permute.xlu1 %195 }
  0x8f   :  { %v153_v35 = vpop.permute.xlu0 %152 }
  0x90   :  { %v180_v48 = vpop.permute.xlu1 %179 }
  0x93   :  { %v201_v47 = vpop.permute.xlu0 %200 }
  0x94   :  { %v224_v61 = vpop.permute.xlu1 %223 }
  0x97   :  { %v229_v60 = vpop.permute.xlu0 %228 }
  0x98   :  { %v234_v4 = vpop.permute.xlu1 %233 }
  0x9b   :  { %v239_v1 = vpop.permute.xlu0 %238 }
  0x9c   :  { %v244_v16 = vpop.permute.xlu1 %243 }
  0x9f   :  { %v249_v13 = vpop.permute.xlu0 %248 }
  0xd6   :  { %v123_v31 = vpop.f32.mrb[0].mxu0 }
  0xd7   :  { %vm155_vm4 = vcmp.eq.f32.partialorder %v123_v31, %v143_v26  ;;  %v633_v32 = vpop.f32.mrb[1].mxu0  ;;  %v182_v40 = vmul.f32 %v170_v27, %v123_v31  ;;  %v377_v26 = vld [vmem:[%s943_s7 + $0x10] sm:$0xff]  ;;  %v389_v31 = vpop.permute.xlu0 %388 }
  0xd8   :  { %v589_v33 = vsel %vm155_vm4, 1.0, %v732_v2 }
  0xd9   :  { %v203_v37 = vmul.f32 %v589_v33, %v191_v30 }
  0xda   :  { %v128_v36 = vpop.f32.mrb[2].mxu0 }
  0xdb   :  { %vm156_vm5 = vcmp.eq.f32.partialorder %v128_v36, %v148_v28  ;;  %v636_v38 = vpop.f32.mrb[3].mxu0  ;;  %v183_v41 = vmul.f32 %v175_v29, %v128_v36  ;;  %v206_v45 = vadd.f32 %v203_v37, %v182_v40  ;;  %v384_v29 = vpop.permute.xlu1 %383 }
  0xdc   :  { %v590_v39 = vsel %vm156_vm5, 1.0, %v732_v2 }
  0xdd   :  { %v204_v42 = vmul.f32 %v590_v39, %v196_v34 }
  0xde   :  { %v133_v43 = vpop.f32.mrb[4].mxu0 }
  0xdf   :  { %vm157_vm6 = vcmp.eq.f32.partialorder %v133_v43, %v153_v35  ;;  %v639_v44 = vpop.f32.mrb[5].mxu0  ;;  %v207_v46 = vadd.f32 %v204_v42, %v183_v41  ;;  %v184_v50 = vmul.f32 %v180_v48, %v133_v43  ;;  %v394_v37 = vpop.permute.xlu1 %393  ;;  %v489_v43 = vld [vmem:[%s945_s9] sm:$0x7] }
  0xe0   :  { %v591_v49 = vsel %vm157_vm6, 1.0, %v732_v2  ;;  %v494_v44 = vpop.permute.xlu0 %493 }
  0xe1   :  { %v205_v51 = vmul.f32 %v591_v49, %v201_v47  ;;  %v685_v52 = vpack.c.bf16 %v207_v46, %v206_v45 }
  0xe3   :  { %v208_v53 = vadd.f32 %v205_v51, %v184_v50  ;;  %686 = vmatprep.subr.bf16.mxu1 %v685_v52 }
  0xe4   :  { %688 = vmatpush3.bf16.msra.mxu1 %v685_v52 }
  0xe5   :  { %644 = vmatprep.subr.msk.mxu1 %vm270_vm7, %v208_v53 }
  0xe8   :  { %645 = vmatpush3.msk.msra.mxu1 %vm270_vm7, %v208_v53 }
  0xe9   :  { %647 = vmatmul.mubr.msk.f32.vlgmr.msra.gmra.mrb[0].mxu1 %vm251_vm3, %v210_v54  ;;  %698 = vmatprep.subr.bf16.mxu1 %v735_v59 }
  0xea   :  { %649 = vmatprep.mubr.msk.f32.mxu1 %vm251_vm3, %v211_v55 }
  0xed   :  { %650 = vmatmul.mubr.msk.f32.gmra.mrb[2].mxu1 %vm251_vm3, %v212_v56 }
  0xee   :  { %652 = vmatprep.mubr.msk.f32.mxu1 %vm251_vm3, %v213_v57 }
  0xf1   :  { %653 = vmatmul.mubr.msk.f32.gmra.mrb[4].mxu1 %vm251_vm3, %v214_v58 }
  0xf2   :  { %682 = vmatprep.mubr.msk.f32.mxu1 %vm733_vm1, %v732_v2 }
 0x1bc   :  { %v648_v62 = vpop.f32.mrb[0].mxu1 }
 0x1bd   :  { %v346_v63 = vadd.f32 %v648_v62, %v229_v60  ;;  %v340_v0 = vpop.f32.mrb[1].mxu1 }
 0x1be   :  { %v341_v3 = vadd.f32 %v340_v0, %v224_v61 }
 0x1bf   :  { %v370_v5 = vmax.f32 %v346_v63, 0.0 }
 0x1c0   :  { %v369_v6 = vmax.f32 %v341_v3, 0.0  ;;  %v651_v7 = vpop.f32.mrb[2].mxu1 }
 0x1c1   :  { %v356_v8 = vadd.f32 %v651_v7, %v239_v1  ;;  %v350_v9 = vpop.f32.mrb[3].mxu1 }
 0x1c2   :  { %v690_v10 = vpack.c.bf16 %v370_v5, %v369_v6  ;;  %v351_v11 = vadd.f32 %v350_v9, %v234_v4 }
 0x1c3   :  { %v372_v12 = vmax.f32 %v356_v8, 0.0 }
 0x1c4   :  { %v371_v14 = vmax.f32 %v351_v11, 0.0  ;;  %v654_v15 = vpop.f32.mrb[4].mxu1  ;;  %691 = vmatpush3.bf16.msra.mxu0 %v690_v10 }
 0x1c5   :  { %v366_v17 = vadd.f32 %v654_v15, %v249_v13  ;;  %v360_v18 = vpop.f32.mrb[5].mxu1  ;;  %692 = vmatprep.subr.bf16.mxu0 %v735_v59 }
 0x1c6   :  { %v693_v19 = vpack.c.bf16 %v372_v12, %v371_v14  ;;  %v361_v20 = vadd.f32 %v360_v18, %v244_v16 }
 0x1c7   :  { %v374_v21 = vmax.f32 %v366_v17, 0.0 }
 0x1c8   :  { %v373_v22 = vmax.f32 %v361_v20, 0.0  ;;  %694 = vmatpush3.bf16.msra.mxu0 %v693_v19 }
 0x1c9   :  { %695 = vmatprep.subr.bf16.mxu0 %v735_v59 }
 0x1ca   :  { %v696_v23 = vpack.c.bf16 %v374_v21, %v373_v22 }
 0x1cc   :  { %697 = vmatpush3.bf16.msra.mxu0 %v696_v23 }
 0x1cf   :  { %668 = vmatmul.mubr.msk.f32.vlgmr.msra.gmra.mrb[6].mxu0 %vm396_vm8, %v375_v24 }
 0x1d0   :  { %670 = vmatprep.mubr.msk.f32.mxu0 %vm733_vm1, %v732_v2 }
 0x1d3   :  { %671 = vmatmul.mubr.msk.f32.gmra.mrb[8].mxu0 %vm396_vm8, %v376_v25 }
 0x1d4   :  { %673 = vmatprep.mubr.msk.f32.mxu0 %vm733_vm1, %v732_v2 }
 0x1d7   :  { %674 = vmatmul.mubr.msk.f32.gmra.mrb[10].mxu0 %vm396_vm8, %v377_v26 }
 0x2a2   :  { %v472_v27 = vpop.f32.mrb[6].mxu0 }
 0x2a3   :  { %v669_v28 = vpop.f32.mrb[7].mxu0  ;;  %v473_v30 = vadd.f32 %v472_v27, %v384_v29 }
 0x2a5   :  { %v486_v35 = vmax.f32 %v473_v30, 0.0 }
 0x2a6   :  { %v477_v32 = vpop.f32.mrb[8].mxu0 }
 0x2a7   :  { %v478_v33 = vadd.f32 %v477_v32, %v389_v31  ;;  %v672_v34 = vpop.f32.mrb[9].mxu0 }
 0x2a9   :  { %v487_v36 = vmax.f32 %v478_v33, 0.0 }
 0x2aa   :  { %v482_v38 = vpop.f32.mrb[10].mxu0 }
 0x2ab   :  { %v699_v39 = vpack.c.bf16 %v487_v36, %v486_v35  ;;  %v483_v40 = vadd.f32 %v482_v38, %v394_v37  ;;  %v675_v41 = vpop.f32.mrb[11].mxu0 }
 0x2ad   :  { %700 = vmatpush3.bf16.msra.mxu1 %v699_v39  ;;  %v488_v42 = vmax.f32 %v483_v40, 0.0 }
 0x2ae   :  { %680 = vmatprep.subr.mxu1 %v732_v2 }
 0x2b1   :  { %681 = vmatpush3.msra.mxu1 %v488_v42 }
 0x2b2   :  { %683 = vmatmul.mubr.msk.f32.vlgmr.msra.gmra.mrb[6].mxu1 %vm496_vm9, %v489_v43 }
 0x385   :  { %v566_v45 = vpop.f32.mrb[6].mxu1 }
 0x386   :  { %v567_v46 = vadd.f32 %v566_v45, %v494_v44  ;;  %v684_v47 = vpop.f32.mrb[7].mxu1 }
 0x388   :  { %570 = vst [vmem:[#allocation2] sm:$0x7] %v567_v46 }
 0x389   :  { %719 = shalt.err (!%p716_p4)
}
 0x38a   :  { %s720_s14 = scalar_lea.hbm %s947_s11, 64 }
 0x38b   :  { %p721_p5 = scmp.ne.s32.totalorder %s947_s11, %s720_s14  ;;  %p724_p6 = scmp.lt.u32.totalorder %s720_s14, %s947_s11 }
 0x38d   :  { %p726_p7 = pnand %p724_p6, %p721_p5 }
 0x38f   :  { %729 = shalt.err (!%p726_p7)
}
 0x390   :  { %580 = dma.vmem_to_hbm [thread:$0]  %s578_s30, 64, %s947_s11, [#allocation3]  }
 0x391   :  { %730 = dma.done.wait [#allocation3], 64  }
 0x392   :  { %731 = vsyncadd [#allocation3], 4294967232 }
 0x393   :  { %584 = vsyncpa [#allocation3], 1 }

</bundles_post_ra>
